<compile_context>
chip_gen: v7x
topology: tpu7x:2x2x1
jax: 0.10.0
libtpu: 0.0.40
codegen_flags: <defaults>
</compile_context>

<pallas_src>
from functools import partial

import jax
import jax.numpy as jnp
import numpy as np
from jax import lax
from jax.experimental import pallas as pl
from jax.experimental.pallas import tpu as pltpu


# ---------------------------------------------------------------------------
# Kernel
# ---------------------------------------------------------------------------

def _conv_block_kernel(x_ref, w1_ref, b1_ref, w2_ref, b2_ref, o_ref, *, H, slope):
    """One grid step = nb batch images, both 3x3 convs + biases + LeakyReLUs fused.

    x_ref  : (nb, H, W*Cin)        lane-packed input
    w1_ref : (3, W*Cin,  W*Cmid)   per-kh banded block-Toeplitz weights (kw + W-pad folded)
    b1_ref : (H, W*Cmid)           per-position bias, lane-packed, f32
    w2_ref : (3, W*Cmid, W*Cout)
    b2_ref : (H, W*Cout)
    o_ref  : (nb, H, W*Cout)       lane-dense output (W*Cout multiple of 128 -> unmasked vst)
    """
    nb = x_ref.shape[0]
    M = nb * H

    def conv3x3(lhs, w_ref, b_ref):
        # lhs: (M, K) in the matmul compute dtype.  Three dots on the UNSHIFTED
        # activation (one per kh tap); the H halo is applied to the *results*
        # with a sublane roll + first/last-row mask (XLU slot, overlaps the MXU)
        # instead of sublane-offset slices + lane-axis concats.
        L = w_ref.shape[2]
        z0 = jnp.dot(lhs, w_ref[0], preferred_element_type=jnp.float32)
        z1 = jnp.dot(lhs, w_ref[1], preferred_element_type=jnp.float32)
        z2 = jnp.dot(lhs, w_ref[2], preferred_element_type=jnp.float32)
        # out[h] = z0[h-1] + z1[h] + z2[h+1]; rows -1 / H are the zero padding.
        z0r = pltpu.roll(z0, shift=1, axis=0).reshape(nb, H, L)
        z2r = pltpu.roll(z2, shift=M - 1, axis=0).reshape(nb, H, L)
        h_idx = lax.broadcasted_iota(jnp.int32, (nb, H, L), 1)
        z0r = jnp.where(h_idx == 0, 0.0, z0r)        # zero pad above row 0
        z2r = jnp.where(h_idx == H - 1, 0.0, z2r)    # zero pad below row H-1
        acc = z0r + z1.reshape(nb, H, L) + z2r + b_ref[...][None]   # f32 epilogue
        return jnp.where(acc >= 0, acc, slope * acc)                # LeakyReLU(slope)

    x = x_ref[...].reshape(M, x_ref.shape[2]).astype(w1_ref.dtype)
    h1 = conv3x3(x, w1_ref, b1_ref)                                  # (nb, H, W*Cmid) f32
    h2 = conv3x3(h1.reshape(M, h1.shape[2]).astype(w2_ref.dtype), w2_ref, b2_ref)
    o_ref[...] = h2.astype(o_ref.dtype)


# ---------------------------------------------------------------------------
# One-time parameter preprocessing (init-time, NOT per forward)
# ---------------------------------------------------------------------------

def _weight_norm_effective(v, g):
    """weight_norm with dim=0: w = g * v / ||v||, norm over dims (1, 2, 3)."""
    norm = jnp.sqrt(jnp.sum(v.astype(jnp.float32) ** 2, axis=(1, 2, 3), keepdims=True))
    return g.reshape(-1, 1, 1, 1) * v.astype(jnp.float32) / norm


def _band_weights(w_oihw, width):
    """(3, width*Cin, width*Cout): one banded block-Toeplitz matrix per kh tap,
    matching the lane-packed (w*C + c) layout:

      mats[kh, w'*Ci + ci, w*Co + co] = w[co, ci, kh, w'-w+1]  if |w'-w| <= 1 else 0

    Edge clipping of the band == zero padding along W.

    NOTE: only a 3-block band is populated, so the matmul does ~width/3 redundant
    zero MACs and the weight grows O(width^2) in VMEM.  Fine for width <= ~32;
    beyond that, tile the W axis in the grid or switch to per-kw dots combined
    with pltpu.roll along the lane axis (especially on 64 MiB-VMEM v7x).
    """
    Co, Ci, KH, KW = w_oihw.shape
    w = w_oihw.astype(jnp.float32)
    mats = []
    for kh in range(KH):
        m = jnp.zeros((width * Ci, width * Co), jnp.float32)
        for kw in range(KW):
            shift = jnp.eye(width, k=1 - kw, dtype=jnp.float32)  # E[w',w]=1 iff w'=w+kw-1
            m = m + jnp.kron(shift, w[:, :, kh, kw].T)
        mats.append(m)
    return jnp.stack(mats, axis=0)


def _pack_bias(b_chw):
    """(C, H, W) -> (H, W*C) lane-packed, f32."""
    C, H, W = b_chw.shape
    return jnp.transpose(b_chw, (1, 2, 0)).reshape(H, W * C).astype(jnp.float32)


def prepare_conv_block_params(v1, g1, bias1, v2, g2, bias2, *, width,
                              compute_dtype=jnp.float32):
    """One-time parameter preprocessing.  Call at init and reuse every forward.

    compute_dtype: dtype of the matmul operands.  jnp.bfloat16 recommended on
    v6e/v7x (native-bf16 MXU, halves resident weight VMEM); keep jnp.float32 on
    v5e unless MXU-bound.  The bias-add / LeakyReLU epilogue is always f32.
    """
    w1 = _weight_norm_effective(v1, g1)
    w2 = _weight_norm_effective(v2, g2)
    w1s = _band_weights(w1, width).astype(compute_dtype)   # (3, W*Cin,  W*Cmid)
    w2s = _band_weights(w2, width).astype(compute_dtype)   # (3, W*Cmid, W*Cout)
    b1p = _pack_bias(bias1)                                 # (H, W*Cmid) f32
    b2p = _pack_bias(bias2)                                 # (H, W*Cout) f32
    return w1s, b1p, w2s, b2p


# ---------------------------------------------------------------------------
# Generation-aware tiling
# ---------------------------------------------------------------------------

def _tpu_generation():
    """(num_tensorcores_per_chip, vmem_bytes_per_tensorcore), safe default."""
    try:
        kind = jax.devices()[0].device_kind.lower()
    except Exception:
        kind = ""
    if "v7" in kind:
        return 2, 64 * 1024 * 1024       # v7x: 2 TCs/chip, 64 MiB VMEM per TC
    return 1, 128 * 1024 * 1024           # v5e / v6e: 1 TC, 128 MiB VMEM


def _pick_nb(N, H, W, cin, cmid, cout):
    """Batch images per grid step.

    * v5e/v6e (1 TensorCore): do NOT split the grid for a second core that does
      not exist; grow nb until the folded matmul M dim (nb*H) fills MXU passes.
      Extra grid steps only buy DMA/compute overlap at large N.
    * v7x (2 TensorCores): keep >= 2 grid steps so both cores get work, and cap
      nb against the smaller 64 MiB VMEM.
    """
    num_tc, vmem_cap = _tpu_generation()
    # Rough per-batch-element VMEM in one grid step: double-buffered input +
    # output blocks plus ~4 activation-sized f32 intermediates (z0/z1/z2, h1).
    per_b = H * W * 4 * (2 * cin + 2 * cout + 4 * max(cmid, cout))
    nb_vmem = max(1, (vmem_cap // 2) // max(per_b, 1))
    nb_mxu = max(1, pl.cdiv(512, H))      # ~2 full MXU passes of M rows per step
    nb = max(1, min(N, nb_vmem, nb_mxu))
    if num_tc >= 2 and N >= 2:
        nb = min(nb, N // 2)              # >= 2 grid steps on 2-TC v7x
    while N % nb:                          # keep the grid exact
        nb -= 1
    return nb


# ---------------------------------------------------------------------------
# Hot-path forward (lane-packed activations end-to-end)
# ---------------------------------------------------------------------------

def conv_block_noskip_packed(x_packed, w1s, b1p, w2s, b2p, *, width,
                             slope=0.2, nb=None):
    """Forward on lane-packed activations.

    x_packed : (N, H, W*Cin) with x_packed[n, h, w*Cin + c] = x_nchw[n, c, h, w]
    returns  : (N, H, W*Cout) in the same packing.

    Keep activations in this layout in the surrounding model; the NCHW helpers
    below are verification glue only (each adds a full-activation HBM round-trip).
    """
    N, H, L_in = x_packed.shape
    cin = L_in // width
    cmid = w1s.shape[2] // width
    cout = w2s.shape[2] // width
    assert w1s.shape[1] == L_in and w2s.shape[1] == w1s.shape[2]
    assert b1p.shape == (H, width * cmid) and b2p.shape == (H, width * cout)
    # Correct for any shape; output stores are only fully lane-dense (unmasked
    # vst) when W*Cout is a multiple of 128 (true here: 16*8 = 128).

    if nb is None:
        nb = _pick_nb(N, H, width, cin, cmid, cout)
    assert N % nb == 0

    # True 3x3-conv FLOPs (not the banded-matmul count, ~W/3x larger).
    flops = 2 * N * H * width * 9 * (cin * cmid + cmid * cout)
    w_itemsize = jnp.dtype(w1s.dtype).itemsize
    x_itemsize = jnp.dtype(x_packed.dtype).itemsize
    bytes_accessed = (x_packed.size * x_itemsize
                      + (w1s.size + w2s.size) * w_itemsize
                      + (b1p.size + b2p.size) * 4
                      + N * H * width * cout * x_itemsize)

    # Explicit VMEM limit: double-buffered I/O blocks + resident weights/biases
    # + live f32 intermediates, clamped to the generation's physical VMEM.
    _, vmem_cap = _tpu_generation()
    step_bytes = (2 * (nb * H * width * cin + nb * H * width * cout) * x_itemsize
                  + (w1s.size + w2s.size) * w_itemsize
                  + (b1p.size + b2p.size) * 4
                  + 6 * nb * H * width * max(cmid, cout) * 4)
    vmem_limit = int(min(vmem_cap, max(32 * 1024 * 1024, 2 * step_bytes)))

    return pl.pallas_call(
        partial(_conv_block_kernel, H=H, slope=slope),
        out_shape=jax.ShapeDtypeStruct((N, H, width * cout), x_packed.dtype),
        grid_spec=pltpu.PrefetchScalarGridSpec(
            num_scalar_prefetch=0,
            grid=(N // nb,),
            in_specs=[
                pl.BlockSpec((nb, H, width * cin), lambda n: (n, 0, 0)),
                pl.BlockSpec((3, width * cin, width * cmid), lambda n: (0, 0, 0)),
                pl.BlockSpec((H, width * cmid), lambda n: (0, 0)),
                pl.BlockSpec((3, width * cmid, width * cout), lambda n: (0, 0, 0)),
                pl.BlockSpec((H, width * cout), lambda n: (0, 0)),
            ],
            out_specs=pl.BlockSpec((nb, H, width * cout), lambda n: (n, 0, 0)),
        ),
        compiler_params=pltpu.CompilerParams(
            dimension_semantics=("parallel",),
            vmem_limit_bytes=vmem_limit),
        cost_estimate=pl.CostEstimate(flops=flops, transcendentals=0,
                                      bytes_accessed=bytes_accessed),
    )(x_packed, w1s, b1p, w2s, b2p)


# ---------------------------------------------------------------------------
# Layout helpers / NCHW compatibility wrapper (verification glue, not hot path)
# ---------------------------------------------------------------------------

def pack_nchw(x_nchw):
    """(N, C, H, W) -> lane-packed (N, H, W*C)."""
    N, C, H, W = x_nchw.shape
    return jnp.transpose(x_nchw, (0, 2, 3, 1)).reshape(N, H, W * C)


def unpack_nchw(x_packed, channels):
    """Lane-packed (N, H, W*C) -> (N, C, H, W)."""
    N, H, L = x_packed.shape
    W = L // channels
    return jnp.transpose(x_packed.reshape(N, H, W, channels), (0, 3, 1, 2))


def conv_block_noskip_nchw(x_nchw, w1s, b1p, w2s, b2p, *, width, slope=0.2, nb=None):
    """Drop-in NCHW wrapper (two extra full-activation HBM round-trips;
    for verification/compat only -- keep activations packed in production)."""
    cout = w2s.shape[2] // width
    y = conv_block_noskip_packed(pack_nchw(x_nchw), w1s, b1p, w2s, b2p,
                                 width=width, slope=slope, nb=nb)
    return unpack_nchw(y, cout)


# ---------------------------------------------------------------------------
# Pure-JAX reference (mirrors the PyTorch module)
# ---------------------------------------------------------------------------

def _reference_forward(x, w1, b1, w2, b2, slope=0.2):
    dn = ("NCHW", "OIHW", "NCHW")
    h = lax.conv_general_dilated(x, w1, (1, 1), "SAME", dimension_numbers=dn)
    h = h + b1[None]
    h = jnp.where(h >= 0, h, slope * h)
    h = lax.conv_general_dilated(h, w2, (1, 1), "SAME", dimension_numbers=dn)
    h = h + b2[None]
    h = jnp.where(h >= 0, h, slope * h)
    return h


if __name__ == "__main__":
    # Small shapes consistent with the module.
    N, Cin, Cout, S = 2, 4, 8, 16
    K = 3
    slope = 0.2

    key = jax.random.PRNGKey(0)
    k1, k2, k3, k4, k5, k6, k7 = jax.random.split(key, 7)

    x = jax.random.normal(k1, (N, Cin, S, S), dtype=jnp.float32)

    # Deterministic synthetic parameters (shapes from __init__).
    fan = Cin * K * K
    v1 = jax.random.normal(k2, (Cin, Cin, K, K), jnp.float32) / np.sqrt(fan)
    g1 = 1.0 + 0.1 * jax.random.normal(k3, (Cin,), jnp.float32)
    bias1 = 0.1 * jax.random.normal(k4, (Cin, S, S), jnp.float32)

    v2 = jax.random.normal(k5, (Cout, Cin, K, K), jnp.float32) / np.sqrt(fan)
    g2 = 1.0 + 0.1 * jax.random.normal(k6, (Cout,), jnp.float32)
    bias2 = 0.1 * jax.random.normal(k7, (Cout, S, S), jnp.float32)

    # ---- one-time init (hoisted out of the hot path) ----
    # compute_dtype=jnp.bfloat16 is recommended on v6e/v7x; f32 keeps the
    # correctness check tight here and is the right choice on v5e.
    w1s, b1p, w2s, b2p = prepare_conv_block_params(
        v1, g1, bias1, v2, g2, bias2, width=S, compute_dtype=jnp.float32)
    x_packed = pack_nchw(x)   # the surrounding model should keep this layout

    # ---- hot path: a single pallas_call on lane-packed activations ----
    out_packed = conv_block_noskip_packed(x_packed, w1s, b1p, w2s, b2p,
                                          width=S, slope=slope)
    out_packed = jax.block_until_ready(out_packed)

    # ---- verify against the NCHW reference ----
    w1_eff = _weight_norm_effective(v1, g1)
    w2_eff = _weight_norm_effective(v2, g2)
    ref = jax.block_until_ready(
        _reference_forward(x, w1_eff, bias1, w2_eff, bias2, slope=slope))
    out = unpack_nchw(out_packed, Cout)

    np.testing.assert_allclose(np.asarray(out), np.asarray(ref),
                               rtol=1e-2, atol=1e-2)
    print("KERNEL_OK")
</pallas_src>

<mosaic_0001>
module attributes {stable_mosaic.version = 11 : i64} {
  func.func @_conv_block_kernel(%arg0: i32, %arg1: memref<2x16x64xf32, #tpu.memory_space<vmem>>, %arg2: memref<3x64x64xf32, #tpu.memory_space<vmem>>, %arg3: memref<16x64xf32, #tpu.memory_space<vmem>>, %arg4: memref<3x64x128xf32, #tpu.memory_space<vmem>>, %arg5: memref<16x128xf32, #tpu.memory_space<vmem>>, %arg6: memref<2x16x128xf32, #tpu.memory_space<vmem>>) attributes {dimension_semantics = [#tpu.dimension_semantics<parallel>], iteration_bounds = array<i64: 1>, scalar_prefetch = 0 : i64, scratch_operands = 0 : i64, tpu.core_type = #tpu.core_type<tc>, window_params = [{transform_indices = @transform_0, window_bounds = array<i64: 2, 16, 64>}, {pipeline_mode = #tpu.pipeline_mode<synchronous>, transform_indices = @transform_1, window_bounds = array<i64: 3, 64, 64>}, {pipeline_mode = #tpu.pipeline_mode<synchronous>, transform_indices = @transform_2, window_bounds = array<i64: 16, 64>}, {pipeline_mode = #tpu.pipeline_mode<synchronous>, transform_indices = @transform_3, window_bounds = array<i64: 3, 64, 128>}, {pipeline_mode = #tpu.pipeline_mode<synchronous>, transform_indices = @transform_4, window_bounds = array<i64: 16, 128>}, {transform_indices = @transform_5, window_bounds = array<i64: 2, 16, 128>}]} {
    %c0 = arith.constant 0 : index
    %c0_0 = arith.constant 0 : index
    %c0_1 = arith.constant 0 : index
    %0 = vector.load %arg1[%c0, %c0_0, %c0_1] : memref<2x16x64xf32, #tpu.memory_space<vmem>>, vector<2x16x64xf32>
    %1 = vector.shape_cast %0 : vector<2x16x64xf32> to vector<32x64xf32>
    %c0_2 = arith.constant 0 : index
    %c0_3 = arith.constant 0 : index
    %c0_4 = arith.constant 0 : index
    %2 = vector.load %arg2[%c0_2, %c0_3, %c0_4] : memref<3x64x64xf32, #tpu.memory_space<vmem>>, vector<1x64x64xf32>
    %3 = vector.shape_cast %2 : vector<1x64x64xf32> to vector<64x64xf32>
    %cst = arith.constant dense<0.000000e+00> : vector<32x64xf32>
    %4 = tpu.matmul %1, %3, %cst {dimension_numbers = #tpu.dot_dimension_numbers<[1], [0], [0], [1], [0, 0, 1, 1], [], []>} : vector<32x64xf32>, vector<64x64xf32>, vector<32x64xf32> -> vector<32x64xf32>
    %c1 = arith.constant 1 : index
    %c0_5 = arith.constant 0 : index
    %c0_6 = arith.constant 0 : index
    %5 = vector.load %arg2[%c1, %c0_5, %c0_6] : memref<3x64x64xf32, #tpu.memory_space<vmem>>, vector<1x64x64xf32>
    %6 = vector.shape_cast %5 : vector<1x64x64xf32> to vector<64x64xf32>
    %cst_7 = arith.constant dense<0.000000e+00> : vector<32x64xf32>
    %7 = tpu.matmul %1, %6, %cst_7 {dimension_numbers = #tpu.dot_dimension_numbers<[1], [0], [0], [1], [0, 0, 1, 1], [], []>} : vector<32x64xf32>, vector<64x64xf32>, vector<32x64xf32> -> vector<32x64xf32>
    %c2 = arith.constant 2 : index
    %c0_8 = arith.constant 0 : index
    %c0_9 = arith.constant 0 : index
    %8 = vector.load %arg2[%c2, %c0_8, %c0_9] : memref<3x64x64xf32, #tpu.memory_space<vmem>>, vector<1x64x64xf32>
    %9 = vector.shape_cast %8 : vector<1x64x64xf32> to vector<64x64xf32>
    %cst_10 = arith.constant dense<0.000000e+00> : vector<32x64xf32>
    %10 = tpu.matmul %1, %9, %cst_10 {dimension_numbers = #tpu.dot_dimension_numbers<[1], [0], [0], [1], [0, 0, 1, 1], [], []>} : vector<32x64xf32>, vector<64x64xf32>, vector<32x64xf32> -> vector<32x64xf32>
    %c1_i32 = arith.constant 1 : i32
    %11 = tpu.dynamic_rotate %4 by %c1_i32 dim 0 : vector<32x64xf32>, i32 -> vector<32x64xf32>
    %12 = vector.shape_cast %11 : vector<32x64xf32> to vector<2x16x64xf32>
    %c31_i32 = arith.constant 31 : i32
    %13 = tpu.dynamic_rotate %10 by %c31_i32 dim 0 : vector<32x64xf32>, i32 -> vector<32x64xf32>
    %14 = vector.shape_cast %13 : vector<32x64xf32> to vector<2x16x64xf32>
    %15 = tpu.iota {dimensions = array<i32: 1>} : vector<2x16x64xi32>
    %c0_i32 = arith.constant 0 : i32
    %16 = vector.broadcast %c0_i32 : i32 to vector<2x16x64xi32>
    %17 = arith.cmpi eq, %15, %16 : vector<2x16x64xi32>
    %cst_11 = arith.constant 0.000000e+00 : f32
    %18 = vector.broadcast %cst_11 : f32 to vector<2x16x64xf32>
    %19 = arith.select %17, %18, %12 : vector<2x16x64xi1>, vector<2x16x64xf32>
    %c15_i32 = arith.constant 15 : i32
    %20 = vector.broadcast %c15_i32 : i32 to vector<2x16x64xi32>
    %21 = arith.cmpi eq, %15, %20 : vector<2x16x64xi32>
    %cst_12 = arith.constant 0.000000e+00 : f32
    %22 = vector.broadcast %cst_12 : f32 to vector<2x16x64xf32>
    %23 = arith.select %21, %22, %14 : vector<2x16x64xi1>, vector<2x16x64xf32>
    %24 = vector.shape_cast %7 : vector<32x64xf32> to vector<2x16x64xf32>
    %25 = arith.addf %19, %24 : vector<2x16x64xf32>
    %26 = arith.addf %25, %23 : vector<2x16x64xf32>
    %c0_13 = arith.constant 0 : index
    %c0_14 = arith.constant 0 : index
    %27 = vector.load %arg3[%c0_13, %c0_14] : memref<16x64xf32, #tpu.memory_space<vmem>>, vector<16x64xf32>
    %28 = vector.shape_cast %27 : vector<16x64xf32> to vector<1x16x64xf32>
    %29 = vector.broadcast %28 : vector<1x16x64xf32> to vector<2x16x64xf32>
    %30 = arith.addf %26, %29 : vector<2x16x64xf32>
    %cst_15 = arith.constant 0.000000e+00 : f32
    %31 = vector.broadcast %cst_15 : f32 to vector<2x16x64xf32>
    %32 = arith.cmpf oge, %30, %31 : vector<2x16x64xf32>
    %cst_16 = arith.constant 2.000000e-01 : f32
    %33 = vector.broadcast %cst_16 : f32 to vector<2x16x64xf32>
    %34 = arith.mulf %33, %30 : vector<2x16x64xf32>
    %35 = arith.select %32, %30, %34 : vector<2x16x64xi1>, vector<2x16x64xf32>
    %36 = vector.shape_cast %35 : vector<2x16x64xf32> to vector<32x64xf32>
    %c0_17 = arith.constant 0 : index
    %c0_18 = arith.constant 0 : index
    %c0_19 = arith.constant 0 : index
    %37 = vector.load %arg4[%c0_17, %c0_18, %c0_19] : memref<3x64x128xf32, #tpu.memory_space<vmem>>, vector<1x64x128xf32>
    %38 = vector.shape_cast %37 : vector<1x64x128xf32> to vector<64x128xf32>
    %cst_20 = arith.constant dense<0.000000e+00> : vector<32x128xf32>
    %39 = tpu.matmul %36, %38, %cst_20 {dimension_numbers = #tpu.dot_dimension_numbers<[1], [0], [0], [1], [0, 0, 1, 1], [], []>} : vector<32x64xf32>, vector<64x128xf32>, vector<32x128xf32> -> vector<32x128xf32>
    %c1_21 = arith.constant 1 : index
    %c0_22 = arith.constant 0 : index
    %c0_23 = arith.constant 0 : index
    %40 = vector.load %arg4[%c1_21, %c0_22, %c0_23] : memref<3x64x128xf32, #tpu.memory_space<vmem>>, vector<1x64x128xf32>
    %41 = vector.shape_cast %40 : vector<1x64x128xf32> to vector<64x128xf32>
    %cst_24 = arith.constant dense<0.000000e+00> : vector<32x128xf32>
    %42 = tpu.matmul %36, %41, %cst_24 {dimension_numbers = #tpu.dot_dimension_numbers<[1], [0], [0], [1], [0, 0, 1, 1], [], []>} : vector<32x64xf32>, vector<64x128xf32>, vector<32x128xf32> -> vector<32x128xf32>
    %c2_25 = arith.constant 2 : index
    %c0_26 = arith.constant 0 : index
    %c0_27 = arith.constant 0 : index
    %43 = vector.load %arg4[%c2_25, %c0_26, %c0_27] : memref<3x64x128xf32, #tpu.memory_space<vmem>>, vector<1x64x128xf32>
    %44 = vector.shape_cast %43 : vector<1x64x128xf32> to vector<64x128xf32>
    %cst_28 = arith.constant dense<0.000000e+00> : vector<32x128xf32>
    %45 = tpu.matmul %36, %44, %cst_28 {dimension_numbers = #tpu.dot_dimension_numbers<[1], [0], [0], [1], [0, 0, 1, 1], [], []>} : vector<32x64xf32>, vector<64x128xf32>, vector<32x128xf32> -> vector<32x128xf32>
    %c1_i32_29 = arith.constant 1 : i32
    %46 = tpu.dynamic_rotate %39 by %c1_i32_29 dim 0 : vector<32x128xf32>, i32 -> vector<32x128xf32>
    %47 = vector.shape_cast %46 : vector<32x128xf32> to vector<2x16x128xf32>
    %c31_i32_30 = arith.constant 31 : i32
    %48 = tpu.dynamic_rotate %45 by %c31_i32_30 dim 0 : vector<32x128xf32>, i32 -> vector<32x128xf32>
    %49 = vector.shape_cast %48 : vector<32x128xf32> to vector<2x16x128xf32>
    %50 = tpu.iota {dimensions = array<i32: 1>} : vector<2x16x128xi32>
    %c0_i32_31 = arith.constant 0 : i32
    %51 = vector.broadcast %c0_i32_31 : i32 to vector<2x16x128xi32>
    %52 = arith.cmpi eq, %50, %51 : vector<2x16x128xi32>
    %cst_32 = arith.constant 0.000000e+00 : f32
    %53 = vector.broadcast %cst_32 : f32 to vector<2x16x128xf32>
    %54 = arith.select %52, %53, %47 : vector<2x16x128xi1>, vector<2x16x128xf32>
    %c15_i32_33 = arith.constant 15 : i32
    %55 = vector.broadcast %c15_i32_33 : i32 to vector<2x16x128xi32>
    %56 = arith.cmpi eq, %50, %55 : vector<2x16x128xi32>
    %cst_34 = arith.constant 0.000000e+00 : f32
    %57 = vector.broadcast %cst_34 : f32 to vector<2x16x128xf32>
    %58 = arith.select %56, %57, %49 : vector<2x16x128xi1>, vector<2x16x128xf32>
    %59 = vector.shape_cast %42 : vector<32x128xf32> to vector<2x16x128xf32>
    %60 = arith.addf %54, %59 : vector<2x16x128xf32>
    %61 = arith.addf %60, %58 : vector<2x16x128xf32>
    %c0_35 = arith.constant 0 : index
    %c0_36 = arith.constant 0 : index
    %62 = vector.load %arg5[%c0_35, %c0_36] : memref<16x128xf32, #tpu.memory_space<vmem>>, vector<16x128xf32>
    %63 = vector.shape_cast %62 : vector<16x128xf32> to vector<1x16x128xf32>
    %64 = vector.broadcast %63 : vector<1x16x128xf32> to vector<2x16x128xf32>
    %65 = arith.addf %61, %64 : vector<2x16x128xf32>
    %cst_37 = arith.constant 0.000000e+00 : f32
    %66 = vector.broadcast %cst_37 : f32 to vector<2x16x128xf32>
    %67 = arith.cmpf oge, %65, %66 : vector<2x16x128xf32>
    %cst_38 = arith.constant 2.000000e-01 : f32
    %68 = vector.broadcast %cst_38 : f32 to vector<2x16x128xf32>
    %69 = arith.mulf %68, %65 : vector<2x16x128xf32>
    %70 = arith.select %67, %65, %69 : vector<2x16x128xi1>, vector<2x16x128xf32>
    %c0_39 = arith.constant 0 : index
    %c0_40 = arith.constant 0 : index
    %c0_41 = arith.constant 0 : index
    %71 = vector.load %arg6[%c0_39, %c0_40, %c0_41] : memref<2x16x128xf32, #tpu.memory_space<vmem>>, vector<2x16x128xf32>
    tpu.vector_store %arg6[%c0_39, %c0_40, %c0_41], %70 {strides = array<i32>} : memref<2x16x128xf32, #tpu.memory_space<vmem>>, vector<2x16x128xf32>,
    return
  }
  func.func @transform_0(%arg0: i32) -> (i32, i32, i32) {
    %c0_i32 = arith.constant 0 : i32
    %c0_i32_0 = arith.constant 0 : i32
    %c0_i32_1 = arith.constant 0 : i32
    return %arg0, %c0_i32, %c0_i32_0 : i32, i32, i32
  }
  func.func @transform_1(%arg0: i32) -> (i32, i32, i32) {
    %c0_i32 = arith.constant 0 : i32
    %c0_i32_0 = arith.constant 0 : i32
    %c0_i32_1 = arith.constant 0 : i32
    %c0_i32_2 = arith.constant 0 : i32
    return %c0_i32, %c0_i32_0, %c0_i32_1 : i32, i32, i32
  }
  func.func @transform_2(%arg0: i32) -> (i32, i32) {
    %c0_i32 = arith.constant 0 : i32
    %c0_i32_0 = arith.constant 0 : i32
    %c0_i32_1 = arith.constant 0 : i32
    return %c0_i32, %c0_i32_0 : i32, i32
  }
  func.func @transform_3(%arg0: i32) -> (i32, i32, i32) {
    %c0_i32 = arith.constant 0 : i32
    %c0_i32_0 = arith.constant 0 : i32
    %c0_i32_1 = arith.constant 0 : i32
    %c0_i32_2 = arith.constant 0 : i32
    return %c0_i32, %c0_i32_0, %c0_i32_1 : i32, i32, i32
  }
  func.func @transform_4(%arg0: i32) -> (i32, i32) {
    %c0_i32 = arith.constant 0 : i32
    %c0_i32_0 = arith.constant 0 : i32
    %c0_i32_1 = arith.constant 0 : i32
    return %c0_i32, %c0_i32_0 : i32, i32
  }
  func.func @transform_5(%arg0: i32) -> (i32, i32, i32) {
    %c0_i32 = arith.constant 0 : i32
    %c0_i32_0 = arith.constant 0 : i32
    %c0_i32_1 = arith.constant 0 : i32
    return %arg0, %c0_i32, %c0_i32_0 : i32, i32, i32
  }
}

</mosaic_0001>

<bundles_post_ra>
// kernel: tpu_custom_call.1
= control target key start
LH: loop header
LB: loop body
LE: loop exit
PB: predicated region body
PF: predicated region fallthrough
CT: control target
= control target key end

     0   :  { %10 = vsyncpa [#allocation3], 0  ;;  %s1511_s0 = inlined_call_operand.hbm [shape: f32[2,16,64], index: 0, kind: input, shape index: {}]   ;;  %s1512_s1 = inlined_call_operand.hbm [shape: f32[3,64,64], index: 1, kind: input, shape index: {}]   ;;  %s1513_s2 = inlined_call_operand.hbm [shape: f32[16,64], index: 2, kind: input, shape index: {}]   ;;  %s1514_s3 = inlined_call_operand.hbm [shape: f32[3,64,128], index: 3, kind: input, shape index: {}]   ;;  %s1515_s4 = inlined_call_operand.hbm [shape: f32[16,128], index: 4, kind: input, shape index: {}]   ;;  %s1516_s5 = inlined_call_operand.hbm [shape: f32[2,16,128], index: 5, kind: output, shape index: {}]  }
   0x1   :  { %11 = vsyncpa [#allocation6], 0 }
   0x2   :  { %12 = vsyncpa [#allocation9], 0 }
   0x3   :  { %13 = vsyncpa [#allocation4], 0  ;;  %s1284_s18 = smov [#allocation5]   ;;  %s1285_s20 = smov [#allocation8]  }
   0x4   :  { %s31_s19 = sshll.u32 %s1284_s18, 4  ;;  %s55_s21 = sshll.u32 %s1285_s20, 4  ;;  %s32_s19 = int_to_ptr.vmem [resolvable:$true] %s31_s19  ;;  %s1322_s21 = int_to_ptr.vmem [resolvable:$true] %s55_s21 }
   0x5   :  { %s1144_s24 = scalar_lea.hbm %s1512_s1, 3072 }
   0x6   :  { %p1145_p0 = scmp.ne.s32.totalorder %s1512_s1, %s1144_s24  ;;  %p1148_p1 = scmp.lt.u32.totalorder %s1144_s24, %s1512_s1 }
   0x8   :  { %p1150_p2 = pnand %p1148_p1, %p1145_p0 }
   0xa   :  { %1153 = shalt.err (!%p1150_p2)
}
   0xb   :  { %s1154_s29 = scalar_lea.vmem %s32_s19, 3072  ;;  %p1159_p4 = scmp.lt.s32.totalorder %s32_s19, %s32_s19 }
   0xc   :  { %p1155_p3 = scmp.ne.s32.totalorder %s32_s19, %s1154_s29  ;;  %p1160_p5 = scmp.lt.s32.totalorder %s1154_s29, %s1154_s29 }
   0xe   :  { %p1161_p6 = por %p1160_p5, %p1159_p4 }
  0x10   :  { %p1162_p7 = pnand %p1161_p6, %p1155_p3 }
  0x12   :  { %1165 = shalt.err (!%p1162_p7)
}
  0x13   :  { %s1286_s30 = smov 128   ;;  %s1287_s6 = smov 8  }
  0x14   :  { %37 = dma.hbm_to_vmem [thread:$0]  %s1512_s1, 3072, %s32_s19, [#allocation6], %s1286_s30, %s1286_s30, %s1287_s6  }
  0x15   :  { %s1166_s11 = scalar_lea.hbm %s1514_s3, 3072 }
  0x16   :  { %p1167_p8 = scmp.ne.s32.totalorder %s1514_s3, %s1166_s11  ;;  %p1170_p9 = scmp.lt.u32.totalorder %s1166_s11, %s1514_s3 }
  0x18   :  { %p1172_p10 = pnand %p1170_p9, %p1167_p8 }
  0x1a   :  { %1175 = shalt.err (!%p1172_p10)
}
  0x1b   :  { %s1176_s16 = scalar_lea.vmem %s1322_s21, 3072  ;;  %p1181_p12 = scmp.lt.s32.totalorder %s1322_s21, %s1322_s21 }
  0x1c   :  { %p1177_p11 = scmp.ne.s32.totalorder %s1322_s21, %s1176_s16  ;;  %p1182_p13 = scmp.lt.s32.totalorder %s1176_s16, %s1176_s16 }
  0x1e   :  { %p1183_p0 = por %p1182_p13, %p1181_p12 }
  0x20   :  { %p1184_p1 = pnand %p1183_p0, %p1177_p11 }
  0x22   :  { %1187 = shalt.err (!%p1184_p1)
}
  0x23   :  { %61 = dma.hbm_to_vmem [thread:$0]  %s1514_s3, 3072, %s1322_s21, [#allocation9], %s1286_s30, %s1286_s30, %s1287_s6  }
  0x24   :  { %s1288_s18 = smov [#allocation2]   ;;  %s1289_s20 = smov [#allocation7]  }
  0x25   :  { %s19_s19 = sshll.u32 %s1288_s18, 4  ;;  %s43_s22 = sshll.u32 %s1289_s20, 4  ;;  %s20_s19 = int_to_ptr.vmem [resolvable:$true] %s19_s19  ;;  %s1359_s22 = int_to_ptr.vmem [resolvable:$true] %s43_s22 }
  0x26   :  { %s1188_s25 = scalar_lea.hbm %s1511_s0, 512 }
  0x27   :  { %p1189_p2 = scmp.ne.s32.totalorder %s1511_s0, %s1188_s25  ;;  %p1192_p3 = scmp.lt.u32.totalorder %s1188_s25, %s1511_s0 }
  0x29   :  { %p1194_p4 = pnand %p1192_p3, %p1189_p2 }
  0x2b   :  { %1197 = shalt.err (!%p1194_p4)
}
  0x2c   :  { %s1198_s3 = scalar_lea.vmem %s20_s19, 512  ;;  %p1203_p6 = scmp.lt.s32.totalorder %s20_s19, %s20_s19 }
  0x2d   :  { %p1199_p5 = scmp.ne.s32.totalorder %s20_s19, %s1198_s3  ;;  %p1204_p7 = scmp.lt.s32.totalorder %s1198_s3, %s1198_s3 }
  0x2f   :  { %p1205_p8 = por %p1204_p7, %p1203_p6 }
  0x31   :  { %p1206_p9 = pnand %p1205_p8, %p1199_p5 }
  0x33   :  { %1209 = shalt.err (!%p1206_p9)
}
  0x34   :  { %25 = dma.hbm_to_vmem [thread:$0]  %s1511_s0, 512, %s20_s19, [#allocation3], %s1286_s30, %s1286_s30, %s1287_s6  }
  0x35   :  { %s1210_s10 = scalar_lea.hbm %s1513_s2, 256 }
  0x36   :  { %p1211_p10 = scmp.ne.s32.totalorder %s1513_s2, %s1210_s10  ;;  %p1214_p11 = scmp.lt.u32.totalorder %s1210_s10, %s1513_s2 }
  0x38   :  { %p1216_p12 = pnand %p1214_p11, %p1211_p10 }
  0x3a   :  { %1219 = shalt.err (!%p1216_p12)
}
  0x3b   :  { %s1220_s15 = scalar_lea.vmem %s1359_s22, 256  ;;  %p1225_p0 = scmp.lt.s32.totalorder %s1359_s22, %s1359_s22 }
  0x3c   :  { %p1221_p13 = scmp.ne.s32.totalorder %s1359_s22, %s1220_s15  ;;  %p1226_p1 = scmp.lt.s32.totalorder %s1220_s15, %s1220_s15 }
  0x3e   :  { %p1227_p2 = por %p1226_p1, %p1225_p0 }
  0x40   :  { %p1228_p3 = pnand %p1227_p2, %p1221_p13 }
  0x42   :  { %1231 = shalt.err (!%p1228_p3)
}
  0x43   :  { %49 = dma.hbm_to_vmem [thread:$0]  %s1513_s2, 256, %s1359_s22, [#allocation6], %s1286_s30, %s1286_s30, %s1287_s6  }
  0x44   :  { %s1290_s1 = smov [#allocation10]   ;;  %s1232_s20 = scalar_lea.hbm %s1515_s4, 256 }
  0x45   :  { %s67_s17 = sshll.u32 %s1290_s1, 4  ;;  %p1233_p4 = scmp.ne.s32.totalorder %s1515_s4, %s1232_s20  ;;  %s68_s17 = int_to_ptr.vmem [resolvable:$true] %s67_s17 }
  0x46   :  { %p1236_p5 = scmp.lt.u32.totalorder %s1232_s20, %s1515_s4 }
  0x48   :  { %p1238_p6 = pnand %p1236_p5, %p1233_p4 }
  0x4a   :  { %1241 = shalt.err (!%p1238_p6)
}
  0x4b   :  { %s1242_s27 = scalar_lea.vmem %s68_s17, 256  ;;  %p1247_p8 = scmp.lt.s32.totalorder %s68_s17, %s68_s17 }
  0x4c   :  { %p1243_p7 = scmp.ne.s32.totalorder %s68_s17, %s1242_s27  ;;  %p1248_p9 = scmp.lt.s32.totalorder %s1242_s27, %s1242_s27 }
  0x4e   :  { %p1249_p10 = por %p1248_p9, %p1247_p8 }
  0x50   :  { %p1250_p11 = pnand %p1249_p10, %p1243_p7 }
  0x52   :  { %1253 = shalt.err (!%p1250_p11)
}
  0x53   :  { %73 = dma.hbm_to_vmem [thread:$0]  %s1515_s4, 256, %s68_s17, [#allocation9], %s1286_s30, %s1286_s30, %s1287_s6  }
  0x54   :  { %1276 = dma.done.wait [#allocation3], 512  }
  0x55   :  { %1277 = vsyncadd [#allocation3], 4294966784 }
  0x56   :  { %1278 = dma.done.wait [#allocation6], 3328  }
  0x57   :  { %1279 = vsyncadd [#allocation6], 4294963968 }
  0x58   :  { %1280 = dma.done.wait [#allocation9], 3328  }
  0x59   :  { %1281 = vsyncadd [#allocation9], 4294963968  ;;  %v93_v0 = vld [vmem:[#allocation5] sm:$0xff]  ;;  %v94_v1 = vld [vmem:[#allocation5 + $0x8] sm:$0xff]  ;;  %vm101_vm0 = vcmask 523264   ;;  %s1291_s4 = smov [#allocation11]  }
  0x5a   :  { %v95_v2 = vld [vmem:[#allocation5 + $0x10] sm:$0xff]  ;;  %v1040_v3 = vpack.c.bf16 %v94_v1, %v93_v0  ;;  %v96_v4 = vld [vmem:[#allocation5 + $0x18] sm:$0xff]  ;;  %v200_v5 = vld [vmem:[#allocation5 + $0x40] sm:$0xff]  ;;  %s798_s28 = sshll.u32 %s1291_s4, 4  ;;  %s799_s28 = int_to_ptr.vmem [resolvable:$true] %s798_s28 }
  0x5b   :  { %v201_v6 = vld [vmem:[#allocation5 + $0x48] sm:$0xff]  ;;  %v1044_v7 = vpack.c.bf16 %v96_v4, %v95_v2  ;;  %v97_v9 = vld [vmem:[#allocation5 + $0x20] sm:$0xff]  ;;  %v202_v11 = vld [vmem:[#allocation5 + $0x50] sm:$0xff]  ;;  %s1254_s29 = scalar_lea.vmem %s799_s28, 512  ;;  %p1259_p13 = scmp.lt.s32.totalorder %s799_s28, %s799_s28 }
  0x5c   :  { %v1056_v8 = vpack.c.bf16 %v201_v6, %v200_v5  ;;  %v98_v10 = vld [vmem:[#allocation5 + $0x28] sm:$0xff]  ;;  %1041 = vmatprep.subr.bf16.mxu0 %v1040_v3  ;;  %v203_v12 = vld [vmem:[#allocation5 + $0x58] sm:$0xff]  ;;  %v204_v14 = vld [vmem:[#allocation5 + $0x60] sm:$0xff]  ;;  %p1255_p12 = scmp.ne.s32.totalorder %s799_s28, %s1254_s29  ;;  %p1260_p0 = scmp.lt.s32.totalorder %s1254_s29, %s1254_s29 }
  0x5d   :  { %1043 = vmatpush3.bf16.msra.mxu0 %v1040_v3  ;;  %v1060_v13 = vpack.c.bf16 %v203_v12, %v202_v11  ;;  %v205_v15 = vld [vmem:[#allocation5 + $0x68] sm:$0xff]  ;;  %v89_v16 = vld [vmem:[#allocation2] sm:$0xff]  ;;  %v1048_v17 = vpack.c.bf16 %v98_v10, %v97_v9  ;;  %v99_v18 = vld [vmem:[#allocation5 + $0x30] sm:$0xff]  ;;  %v391_v3 = vlaneseq }
  0x5e   :  { %1057 = vmatprep.subr.bf16.mxu1 %v1056_v8  ;;  %1045 = vmatprep.subr.bf16.mxu0 %v1044_v7  ;;  %v100_v19 = vld [vmem:[#allocation5 + $0x38] sm:$0xff]  ;;  %v1064_v20 = vpack.c.bf16 %v205_v15, %v204_v14  ;;  %v206_v21 = vld [vmem:[#allocation5 + $0x70] sm:$0xff]  ;;  %v294_v25 = vld [vmem:[#allocation5 + $0x80] sm:$0xff]  ;;  %p1261_p1 = por %p1260_p0, %p1259_p13 }
  0x5f   :  { %1059 = vmatpush3.bf16.msra.mxu1 %v1056_v8  ;;  %924 = vmatprep.mubr.msk.f32.mxu0 %vm101_vm0, %v89_v16  ;;  %v207_v22 = vld [vmem:[#allocation5 + $0x78] sm:$0xff]  ;;  %v1052_v23 = vpack.c.bf16 %v100_v19, %v99_v18  ;;  %v295_v26 = vld [vmem:[#allocation5 + $0x88] sm:$0xff]  ;;  %v296_v28 = vld [vmem:[#allocation5 + $0x90] sm:$0xff]  ;;  %v1426_v4 = vshrl.u32 %v391_v3, 7 }
  0x60   :  { %1061 = vmatprep.subr.bf16.mxu1 %v1060_v13  ;;  %946 = vmatprep.mubr.msk.f32.mxu1 %vm101_vm0, %v89_v16  ;;  %v1068_v24 = vpack.c.bf16 %v207_v22, %v206_v21  ;;  %v1072_v27 = vpack.c.bf16 %v295_v26, %v294_v25  ;;  %v297_v29 = vld [vmem:[#allocation5 + $0x98] sm:$0xff]  ;;  %v90_v30 = vld [vmem:[#allocation2 + $0x8] sm:$0xff]  ;;  %v91_v31 = vld [vmem:[#allocation2 + $0x10] sm:$0xff]  ;;  %p1262_p2 = pnand %p1261_p1, %p1255_p12 }
  0x61   :  { %1047 = vmatpush3.bf16.msra.mxu0 %v1044_v7  ;;  %v1076_v32 = vpack.c.bf16 %v297_v29, %v296_v28  ;;  %v298_v33 = vld [vmem:[#allocation5 + $0xa0] sm:$0xff]  ;;  %v299_v34 = vld [vmem:[#allocation5 + $0xa8] sm:$0xff]  ;;  %v92_v35 = vld [vmem:[#allocation2 + $0x18] sm:$0xff]  ;;  %vm393_vm1 = vcmp.lt.s32.totalorder %v1426_v4, 1  ;;  %vm408_vm2 = vcmp.eq.s32.totalorder %v1426_v4, 0  ;;  %vm402_vm3 = vcmp.lt.s32.totalorder %v1426_v4, 7 }
  0x62   :  { %1049 = vmatprep.subr.bf16.mxu0 %v1048_v17  ;;  %v1080_v36 = vpack.c.bf16 %v299_v34, %v298_v33  ;;  %v300_v37 = vld [vmem:[#allocation5 + $0xb0] sm:$0xff]  ;;  %v301_v38 = vld [vmem:[#allocation5 + $0xb8] sm:$0xff]  ;;  %v448_v46 = vld [vmem:[#allocation8 + $0x10] sm:$0xff] }
  0x63   :  { %1063 = vmatpush3.bf16.msra.mxu1 %v1060_v13  ;;  %v1084_v39 = vpack.c.bf16 %v301_v38, %v300_v37  ;;  %v446_v40 = vld [vmem:[#allocation8] sm:$0xff]  ;;  %v447_v41 = vld [vmem:[#allocation8 + $0x8] sm:$0xff]  ;;  %v449_v47 = vld [vmem:[#allocation8 + $0x18] sm:$0xff] }
  0x64   :  { %1065 = vmatprep.subr.bf16.mxu1 %v1064_v20  ;;  %v1088_v42 = vpack.c.bf16 %v447_v41, %v446_v40  ;;  %v552_v43 = vld [vmem:[#allocation8 + $0x40] sm:$0xff]  ;;  %v553_v44 = vld [vmem:[#allocation8 + $0x48] sm:$0xff]  ;;  %v1092_v48 = vpack.c.bf16 %v449_v47, %v448_v46  ;;  %v554_v49 = vld [vmem:[#allocation8 + $0x50] sm:$0xff] }
  0x65   :  { %1051 = vmatpush3.bf16.msra.mxu0 %v1048_v17  ;;  %v1104_v45 = vpack.c.bf16 %v553_v44, %v552_v43  ;;  %v555_v50 = vld [vmem:[#allocation8 + $0x58] sm:$0xff]  ;;  %v450_v52 = vld [vmem:[#allocation8 + $0x20] sm:$0xff]  ;;  %v451_v53 = vld [vmem:[#allocation8 + $0x28] sm:$0xff] }
  0x66   :  { %1053 = vmatprep.subr.bf16.mxu0 %v1052_v23  ;;  %v1108_v51 = vpack.c.bf16 %v555_v50, %v554_v49  ;;  %v1096_v54 = vpack.c.bf16 %v451_v53, %v450_v52  ;;  %v556_v55 = vld [vmem:[#allocation8 + $0x60] sm:$0xff]  ;;  %v557_v56 = vld [vmem:[#allocation8 + $0x68] sm:$0xff]  ;;  %v452_v58 = vld [vmem:[#allocation8 + $0x30] sm:$0xff] }
  0x67   :  { %1067 = vmatpush3.bf16.msra.mxu1 %v1064_v20  ;;  %v1112_v57 = vpack.c.bf16 %v557_v56, %v556_v55  ;;  %v453_v59 = vld [vmem:[#allocation8 + $0x38] sm:$0xff]  ;;  %v558_v61 = vld [vmem:[#allocation8 + $0x70] sm:$0xff]  ;;  %v646_v0 = vld [vmem:[#allocation8 + $0x80] sm:$0xff] }
  0x68   :  { %1069 = vmatprep.subr.bf16.mxu1 %v1068_v24  ;;  %v1100_v60 = vpack.c.bf16 %v453_v59, %v452_v58  ;;  %v559_v62 = vld [vmem:[#allocation8 + $0x78] sm:$0xff]  ;;  %v647_v1 = vld [vmem:[#allocation8 + $0x88] sm:$0xff]  ;;  %v428_v34 = vld [vmem:[#allocation7] sm:$0xff] }
  0x69   :  { %1055 = vmatpush3.bf16.msra.mxu0 %v1052_v23  ;;  %v1116_v63 = vpack.c.bf16 %v559_v62, %v558_v61  ;;  %v1423_v2 = vpack.c.bf16 %v647_v1, %v646_v0  ;;  %v429_v47 = vld [vmem:[#allocation7 + $0x8] sm:$0xff]  ;;  %v648_v53 = vld [vmem:[#allocation8 + $0x90] sm:$0xff]  ;;  %v650_v61 = vld [vmem:[#allocation8 + $0xa0] sm:$0xff] }
  0x6a   :  { %1073 = vmatprep.subr.bf16.mxu0 %v1072_v27  ;;  %v651_v62 = vld [vmem:[#allocation8 + $0xa8] sm:$0xff]  ;;  %v652_v3 = vld [vmem:[#allocation8 + $0xb0] sm:$0xff] }
  0x6b   :  { %1071 = vmatpush3.bf16.msra.mxu1 %v1068_v24  ;;  %v1128_v0 = vpack.c.bf16 %v651_v62, %v650_v61 }
  0x6c   :  { %925 = vmatmul.mubr.msk.f32.vlgmr.msra.gmra.mrb[0].mxu0 %vm101_vm0, %v90_v30  ;;  %1089 = vmatprep.subr.bf16.mxu1 %v1088_v42 }
  0x6d   :  { %1075 = vmatpush3.bf16.msra.mxu0 %v1072_v27  ;;  %927 = vmatprep.mubr.msk.f32.mxu0 %vm101_vm0, %v91_v31 }
  0x6e   :  { %947 = vmatmul.mubr.msk.f32.vlgmr.msra.gmra.mrb[0].mxu1 %vm101_vm0, %v90_v30  ;;  %1077 = vmatprep.subr.bf16.mxu0 %v1076_v32 }
  0x6f   :  { %949 = vmatprep.mubr.msk.f32.mxu1 %vm101_vm0, %v91_v31  ;;  %1091 = vmatpush3.bf16.msra.mxu1 %v1088_v42 }
  0x70   :  { %928 = vmatmul.mubr.msk.f32.gmra.mrb[2].mxu0 %vm101_vm0, %v92_v35  ;;  %1093 = vmatprep.subr.bf16.mxu1 %v1092_v48 }
  0x71   :  { %1079 = vmatpush3.bf16.msra.mxu0 %v1076_v32  ;;  %968 = vmatprep.mubr.msk.f32.mxu0 %vm101_vm0, %v89_v16 }
  0x72   :  { %950 = vmatmul.mubr.msk.f32.gmra.mrb[2].mxu1 %vm101_vm0, %v92_v35  ;;  %1081 = vmatprep.subr.bf16.mxu0 %v1080_v36 }
  0x73   :  { %1095 = vmatpush3.bf16.msra.mxu1 %v1092_v48 }
  0x74   :  { %1097 = vmatprep.subr.bf16.mxu1 %v1096_v54 }
  0x75   :  { %1083 = vmatpush3.bf16.msra.mxu0 %v1080_v36 }
  0x76   :  { %1085 = vmatprep.subr.bf16.mxu0 %v1084_v39 }
  0x77   :  { %1099 = vmatpush3.bf16.msra.mxu1 %v1096_v54  ;;  %v649_v54 = vld [vmem:[#allocation8 + $0x98] sm:$0xff] }
  0x78   :  { %1101 = vmatprep.subr.bf16.mxu1 %v1100_v60  ;;  %v1124_v58 = vpack.c.bf16 %v649_v54, %v648_v53 }
  0x79   :  { %1087 = vmatpush3.bf16.msra.mxu0 %v1084_v39 }
  0x7a   :  { %1105 = vmatprep.subr.bf16.mxu0 %v1104_v45 }
  0x7b   :  { %1103 = vmatpush3.bf16.msra.mxu1 %v1100_v60 }
  0x7c   :  { %969 = vmatmul.mubr.msk.f32.vlgmr.msra.gmra.mrb[4].mxu0 %vm101_vm0, %v90_v30  ;;  %1121 = vmatprep.subr.bf16.mxu1 %v1423_v2  ;;  %v1444_v30 = vadd.s32 8, %v1426_v4 }
  0x7d   :  { %971 = vmatprep.mubr.msk.f32.mxu0 %vm101_vm0, %v91_v31  ;;  %1107 = vmatpush3.bf16.msra.mxu0 %v1104_v45 }
  0x7e   :  { %1109 = vmatprep.subr.bf16.mxu0 %v1108_v51  ;;  %vm415_vm4 = vcmp.eq.s32.totalorder %v1444_v30, 15 }
  0x80   :  { %972 = vmatmul.mubr.msk.f32.gmra.mrb[6].mxu0 %vm101_vm0, %v92_v35 }
  0x81   :  { %1111 = vmatpush3.bf16.msra.mxu0 %v1108_v51 }
  0x82   :  { %1113 = vmatprep.subr.bf16.mxu0 %v1112_v57 }
  0x85   :  { %1115 = vmatpush3.bf16.msra.mxu0 %v1112_v57 }
  0x86   :  { %1117 = vmatprep.subr.bf16.mxu0 %v1116_v63 }
  0x89   :  { %1119 = vmatpush3.bf16.msra.mxu0 %v1116_v63 }
 0x13f   :  { %v926_v5 = vpop.f32.mrb[0].mxu0 }
 0x140   :  { %v388_v6 = vrot.slane %v926_v5, 7  ;;  %v180_v7 = vpop.f32.mrb[1].mxu0  ;;  %v653_v5 = vld [vmem:[#allocation8 + $0xb8] sm:$0xff] }
 0x141   :  { %v387_v8 = vrot.slane %v180_v7, 7  ;;  %v948_v9 = vpop.f32.mrb[0].mxu1 }
 0x142   :  { %v274_v10 = vpop.f32.mrb[1].mxu1 }
 0x143   :  { %v929_v11 = vpop.f32.mrb[2].mxu0  ;;  %v396_v12 = vsel %vm393_vm1, %v387_v8, %v388_v6 }
 0x144   :  { %v390_v13 = vrot.slane %v929_v11, 7  ;;  %v421_v14 = vadd.f32 %v948_v9, %v396_v12  ;;  %v190_v15 = vpop.f32.mrb[3].mxu0 }
 0x145   :  { %v389_v16 = vrot.slane %v190_v15, 7  ;;  %v951_v17 = vpop.f32.mrb[2].mxu1 }
 0x146   :  { %v397_v18 = vsel %vm393_vm1, %v390_v13, %v387_v8  ;;  %v284_v19 = vpop.f32.mrb[3].mxu1 }
 0x147   :  { %v410_v20 = vsel %vm408_vm2, 0.0, %v397_v18  ;;  %v394_v21 = vsel %vm393_vm1, %v389_v16, %v390_v13  ;;  %v395_v22 = vsel %vm393_vm1, %v388_v6, %v389_v16  ;;  %v1132_v6 = vpack.c.bf16 %v653_v5, %v652_v3 }
 0x148   :  { %v420_v23 = vadd.f32 %v410_v20, %v274_v10  ;;  %v423_v24 = vadd.f32 %v951_v17, %v394_v21  ;;  %v412_v25 = vsel %vm408_vm2, 0.0, %v395_v22 }
 0x149   :  { %v422_v26 = vadd.f32 %v412_v25, %v284_v19 }
 0x14f   :  { %v970_v27 = vpop.f32.mrb[4].mxu0 }
 0x150   :  { %v399_v28 = vrot.slane %v970_v27, 1  ;;  %v368_v29 = vpop.f32.mrb[5].mxu0 }
 0x151   :  { %v398_v31 = vrot.slane %v368_v29, 1 }
 0x153   :  { %v405_v32 = vsel %vm402_vm3, %v398_v31, %v399_v28  ;;  %v973_v33 = vpop.f32.mrb[6].mxu0 }
 0x154   :  { %v424_v35 = vadd.f32 %v420_v23, %v405_v32  ;;  %v401_v36 = vrot.slane %v973_v33, 1  ;;  %v378_v37 = vpop.f32.mrb[7].mxu0 }
 0x155   :  { %v400_v38 = vrot.slane %v378_v37, 1 }
 0x156   :  { %v406_v39 = vsel %vm402_vm3, %v401_v36, %v398_v31  ;;  %v430_v40 = vadd.f32 %v428_v34, %v424_v35 }
 0x157   :  { %v419_v41 = vsel %vm415_vm4, 0.0, %v406_v39  ;;  %v403_v42 = vsel %vm402_vm3, %v400_v38, %v401_v36  ;;  %v404_v43 = vsel %vm402_vm3, %v399_v28, %v400_v38 }
 0x158   :  { %v427_v44 = vadd.f32 %v423_v24, %v419_v41  ;;  %v417_v45 = vsel %vm415_vm4, 0.0, %v404_v43  ;;  %v426_v46 = vadd.f32 %v422_v26, %v403_v42  ;;  %vm434_vm5 = vcmp.ge.f32.partialorder %v430_v40, 0.0  ;;  %v772_v43 = vld [vmem:[#allocation10 + $0x8] sm:$0xff] }
 0x159   :  { %v425_v48 = vadd.f32 %v421_v14, %v417_v45  ;;  %v438_v49 = vmul.f32 0.2, %v430_v40 }
 0x15a   :  { %v432_v50 = vadd.f32 %v428_v34, %v426_v46  ;;  %v433_v55 = vadd.f32 %v429_v47, %v427_v44  ;;  %v771_v34 = vld [vmem:[#allocation10] sm:$0xff] }
 0x15b   :  { %v431_v51 = vadd.f32 %v429_v47, %v425_v48  ;;  %v442_v52 = vsel %vm434_vm5, %v430_v40, %v438_v49 }
 0x15c   :  { %990 = vmatprep.mubr.msk.f32.mxu1 %vm101_vm0, %v442_v52  ;;  %1012 = vmatprep.mubr.msk.f32.mxu0 %vm101_vm0, %v442_v52  ;;  %v440_v56 = vmul.f32 0.2, %v432_v50  ;;  %vm436_vm7 = vcmp.ge.f32.partialorder %v432_v50, 0.0  ;;  %v441_v60 = vmul.f32 0.2, %v433_v55  ;;  %vm437_vm8 = vcmp.ge.f32.partialorder %v433_v55, 0.0 }
 0x15d   :  { %vm435_vm6 = vcmp.ge.f32.partialorder %v431_v51, 0.0  ;;  %v439_v57 = vmul.f32 0.2, %v431_v51 }
 0x15e   :  { %v444_v63 = vsel %vm436_vm7, %v432_v50, %v440_v56  ;;  %v445_v1 = vsel %vm437_vm8, %v433_v55, %v441_v60 }
 0x15f   :  { %v443_v59 = vsel %vm435_vm6, %v431_v51, %v439_v57 }
 0x160   :  { %991 = vmatmul.mubr.msk.f32.vlgmr.msra.gmra.mrb[4].mxu1 %vm101_vm0, %v443_v59  ;;  %1013 = vmatmul.mubr.msk.f32.vlgmr.msra.gmra.mrb[8].mxu0 %vm101_vm0, %v443_v59 }
 0x161   :  { %1123 = vmatpush3.bf16.msra.mxu1 %v1423_v2  ;;  %993 = vmatprep.mubr.msk.f32.mxu1 %vm101_vm0, %v444_v63 }
 0x162   :  { %1015 = vmatprep.mubr.msk.f32.mxu0 %vm101_vm0, %v444_v63  ;;  %1125 = vmatprep.subr.bf16.mxu1 %v1124_v58 }
 0x164   :  { %994 = vmatmul.mubr.msk.f32.gmra.mrb[6].mxu1 %vm101_vm0, %v445_v1  ;;  %1016 = vmatmul.mubr.msk.f32.gmra.mrb[10].mxu0 %vm101_vm0, %v445_v1 }
 0x165   :  { %1127 = vmatpush3.bf16.msra.mxu1 %v1124_v58  ;;  %1034 = vmatprep.mubr.msk.f32.mxu1 %vm101_vm0, %v442_v52 }
 0x166   :  { %1129 = vmatprep.subr.bf16.mxu1 %v1128_v0 }
 0x169   :  { %1131 = vmatpush3.bf16.msra.mxu1 %v1128_v0 }
 0x16a   :  { %1133 = vmatprep.subr.bf16.mxu1 %v1132_v6 }
 0x16d   :  { %1135 = vmatpush3.bf16.msra.mxu1 %v1132_v6 }
 0x170   :  { %1035 = vmatmul.mubr.msk.f32.vlgmr.msra.gmra.mrb[8].mxu1 %vm101_vm0, %v443_v59 }
 0x171   :  { %1037 = vmatprep.mubr.msk.f32.mxu1 %vm101_vm0, %v444_v63 }
 0x174   :  { %1038 = vmatmul.mubr.msk.f32.gmra.mrb[10].mxu1 %vm101_vm0, %v445_v1 }
 0x233   :  { %v992_v2 = vpop.f32.mrb[4].mxu1  ;;  %v1014_v7 = vpop.f32.mrb[8].mxu0 }
 0x234   :  { %v740_v8 = vrot.slane %v992_v2, 7  ;;  %v532_v9 = vpop.f32.mrb[5].mxu1  ;;  %v626_v10 = vpop.f32.mrb[9].mxu0 }
 0x235   :  { %v739_v11 = vrot.slane %v532_v9, 7 }
 0x237   :  { %v745_v12 = vsel %vm393_vm1, %v739_v11, %v740_v8  ;;  %v995_v13 = vpop.f32.mrb[6].mxu1  ;;  %v1017_v14 = vpop.f32.mrb[10].mxu0 }
 0x238   :  { %v764_v15 = vadd.f32 %v1014_v7, %v745_v12  ;;  %v742_v16 = vrot.slane %v995_v13, 7  ;;  %v542_v17 = vpop.f32.mrb[7].mxu1  ;;  %v636_v18 = vpop.f32.mrb[11].mxu0 }
 0x239   :  { %v741_v19 = vrot.slane %v542_v17, 7 }
 0x23a   :  { %v746_v20 = vsel %vm393_vm1, %v742_v16, %v739_v11 }
 0x23b   :  { %v755_v21 = vsel %vm408_vm2, 0.0, %v746_v20  ;;  %v743_v22 = vsel %vm393_vm1, %v741_v19, %v742_v16  ;;  %v744_v23 = vsel %vm393_vm1, %v740_v8, %v741_v19 }
 0x23c   :  { %v763_v24 = vadd.f32 %v755_v21, %v626_v10  ;;  %v766_v25 = vadd.f32 %v1017_v14, %v743_v22  ;;  %v757_v26 = vsel %vm408_vm2, 0.0, %v744_v23 }
 0x23d   :  { %v765_v27 = vadd.f32 %v757_v26, %v636_v18 }
 0x243   :  { %v1036_v28 = vpop.f32.mrb[8].mxu1 }
 0x244   :  { %v748_v29 = vrot.slane %v1036_v28, 1  ;;  %v720_v31 = vpop.f32.mrb[9].mxu1 }
 0x245   :  { %v747_v32 = vrot.slane %v720_v31, 1 }
 0x247   :  { %v753_v33 = vsel %vm402_vm3, %v747_v32, %v748_v29  ;;  %v1039_v35 = vpop.f32.mrb[10].mxu1 }
 0x248   :  { %v767_v36 = vadd.f32 %v763_v24, %v753_v33  ;;  %v750_v37 = vrot.slane %v1039_v35, 1  ;;  %v730_v38 = vpop.f32.mrb[11].mxu1 }
 0x249   :  { %v749_v39 = vrot.slane %v730_v38, 1 }
 0x24a   :  { %v773_v40 = vadd.f32 %v771_v34, %v767_v36  ;;  %v754_v41 = vsel %vm402_vm3, %v750_v37, %v747_v32 }
 0x24b   :  { %v762_v42 = vsel %vm415_vm4, 0.0, %v754_v41  ;;  %v751_v44 = vsel %vm402_vm3, %v749_v39, %v750_v37  ;;  %v752_v45 = vsel %vm402_vm3, %v748_v29, %v749_v39 }
 0x24c   :  { %v781_v46 = vmul.f32 0.2, %v773_v40  ;;  %v770_v47 = vadd.f32 %v766_v25, %v762_v42  ;;  %v760_v48 = vsel %vm415_vm4, 0.0, %v752_v45  ;;  %v769_v49 = vadd.f32 %v765_v27, %v751_v44 }
 0x24d   :  { %v768_v50 = vadd.f32 %v764_v15, %v760_v48  ;;  %vm777_vm9 = vcmp.ge.f32.partialorder %v773_v40, 0.0 }
 0x24e   :  { %v776_v51 = vadd.f32 %v772_v43, %v770_v47  ;;  %v775_v52 = vadd.f32 %v771_v34, %v769_v49  ;;  %v785_v53 = vsel %vm777_vm9, %v773_v40, %v781_v46 }
 0x24f   :  { %v774_v54 = vadd.f32 %v772_v43, %v768_v50  ;;  %789 = vst [vmem:[#allocation11] sm:$0xff] %v785_v53 }
 0x250   :  { %v784_v55 = vmul.f32 0.2, %v776_v51  ;;  %v783_v56 = vmul.f32 0.2, %v775_v52  ;;  %vm779_vm10 = vcmp.ge.f32.partialorder %v775_v52, 0.0  ;;  %vm780_vm11 = vcmp.ge.f32.partialorder %v776_v51, 0.0 }
 0x251   :  { %v782_v4 = vmul.f32 0.2, %v774_v54  ;;  %vm778_vm12 = vcmp.ge.f32.partialorder %v774_v54, 0.0 }
 0x252   :  { %v787_v57 = vsel %vm779_vm10, %v775_v52, %v783_v56  ;;  %v788_v58 = vsel %vm780_vm11, %v776_v51, %v784_v55 }
 0x253   :  { %v786_v30 = vsel %vm778_vm12, %v774_v54, %v782_v4  ;;  %791 = vst [vmem:[#allocation11 + $0x10] sm:$0xff] %v787_v57  ;;  %792 = vst [vmem:[#allocation11 + $0x18] sm:$0xff] %v788_v58 }
 0x254   :  { %790 = vst [vmem:[#allocation11 + $0x8] sm:$0xff] %v786_v30 }
 0x255   :  { %1265 = shalt.err (!%p1262_p2)
}
 0x256   :  { %s1266_s7 = scalar_lea.hbm %s1516_s5, 512 }
 0x257   :  { %p1267_p3 = scmp.ne.s32.totalorder %s1516_s5, %s1266_s7  ;;  %p1270_p4 = scmp.lt.u32.totalorder %s1266_s7, %s1516_s5 }
 0x259   :  { %p1272_p5 = pnand %p1270_p4, %p1267_p3 }
 0x25b   :  { %1275 = shalt.err (!%p1272_p5)
}
 0x25c   :  { %804 = dma.vmem_to_hbm [thread:$0]  %s799_s28, 512, %s1516_s5, [#allocation4], %s1286_s30, %s1286_s30, %s1287_s6  }
 0x25d   :  { %1282 = dma.done.wait [#allocation4], 512  }
 0x25e   :  { %1283 = vsyncadd [#allocation4], 4294966784 }
 0x25f   :  { %808 = vsyncpa [#allocation3], 1 }
 0x260   :  { %809 = vsyncpa [#allocation6], 1 }
 0x261   :  { %810 = vsyncpa [#allocation9], 1 }
 0x262   :  { %811 = vsyncpa [#allocation4], 1 }

</bundles_post_ra>
